<compile_context>
chip_gen: v6e
topology: v6e:2x2x1
jax: 0.10.0
libtpu: 0.0.40
codegen_flags: <defaults>
</compile_context>

<pallas_src>
import jax
import jax.numpy as jnp
import numpy as np
from jax.experimental import pallas as pl
from jax.experimental.pallas import tpu as pltpu


def _cdiv(a, b):
    return -(-a // b)


def _transposed_ln_kernel(m_ref, s_ref, x_ref, o_ref):
    # x_ref block: (BB, D, TL).  Reduction over D (sublane axis) is block-local.
    x = x_ref[...].astype(jnp.float32)
    inv_d = jnp.float32(1.0 / x.shape[1])
    mean = jnp.sum(x, axis=1, keepdims=True) * inv_d            # (BB, 1, TL)
    xc = x - mean
    var = jnp.sum(xc * xc, axis=1, keepdims=True) * inv_d       # unbiased=False
    inv_std = jax.lax.rsqrt(var)                                # EUP; no eps (torch parity)
    m = m_ref[0]
    s = s_ref[0]
    o_ref[...] = ((s * inv_std) * (xc + m)).astype(o_ref.dtype)


def _vmem_budgets():
    """Return (per-buffer byte target, scoped-VMEM limit), generation-aware."""
    vmem_cap = None
    try:
        vmem_cap = int(pltpu.get_tpu_info().vmem_capacity_bytes)
    except Exception:
        pass
    if vmem_cap is None or vmem_cap <= 64 * 1024 * 1024:
        # v7x (64 MiB physical per TC) or unknown: bigger tiles (3.2 TB/s HBM),
        # but keep the scoped limit well under physical VMEM.
        return 6 * 1024 * 1024, 44 * 1024 * 1024
    # v5e / v6e: 128 MiB physical (v5e's scoped default is only 16 MiB).
    return 4 * 1024 * 1024, 64 * 1024 * 1024


def _choose_tiling(B, D, L, itemsize, per_buffer_bytes):
    """Pick (BB, TL): block = (BB, D, TL); grid = (cdiv(B,BB), cdiv(L,TL))."""
    row_bytes = max(D * itemsize, 1)
    # Largest lane tile (multiple of 128) that fits the per-buffer budget.
    lane_budget = max(128, (per_buffer_bytes // row_bytes) // 128 * 128)
    if L <= lane_budget:
        TL = L                      # full lane extent (allowed even if not %128)
    else:
        TL = lane_budget            # multiple of 128; last tile gets masked vst
    # If one (D, TL) slab is still small (tiny D), block over batch as well so
    # per-grid-step overhead is amortized.
    tile_bytes = max(D * TL * itemsize, 1)
    BB = max(1, min(B, per_buffer_bytes // tile_bytes))
    # Keep >= 2 grid steps so both v7x TensorCores (and the pipeline) get work.
    if _cdiv(B, BB) * _cdiv(L, TL) < 2:
        if B > 1:
            BB = _cdiv(B, 2)
        elif L >= 256:
            TL = max(128, ((_cdiv(L, 2) + 127) // 128) * 128)
    return BB, TL


def transposed_ln(x, m, s, *, donate_x=False):
    """x: (B, D, *spatial); m, s: shape-(1,) scalar params."""
    B, D = x.shape[0], x.shape[1]
    spatial = x.shape[2:]
    L = int(np.prod(spatial)) if len(spatial) > 0 else 1
    x3 = x.reshape(B, D, L)                 # metadata-only (contiguous)

    itemsize = jnp.dtype(x.dtype).itemsize
    per_buffer, vmem_limit = _vmem_budgets()
    BB, TL = _choose_tiling(B, D, L, itemsize, per_buffer)
    grid = (_cdiv(B, BB), _cdiv(L, TL))

    out = pl.pallas_call(
        _transposed_ln_kernel,
        out_shape=jax.ShapeDtypeStruct((B, D, L), x.dtype),
        grid=grid,
        in_specs=[
            pl.BlockSpec(memory_space=pltpu.SMEM),                # m (scalar)
            pl.BlockSpec(memory_space=pltpu.SMEM),                # s (scalar)
            pl.BlockSpec((BB, D, TL), lambda b, l: (b, 0, l)),    # x tile
        ],
        out_specs=pl.BlockSpec((BB, D, TL), lambda b, l: (b, 0, l)),
        compiler_params=pltpu.CompilerParams(
            dimension_semantics=("parallel", "parallel"),
            vmem_limit_bytes=vmem_limit),
        # Opt-in: reuse x's HBM buffer for the output when the caller donates x.
        input_output_aliases=({2: 0} if donate_x else {}),
    )(m, s, x3)

    return out.reshape(x.shape)             # metadata-only


def _reference(x, m, s):
    xf = x.astype(jnp.float32)
    mean = jnp.mean(xf, axis=1, keepdims=True)
    std = jnp.sqrt(jnp.mean((xf - mean) ** 2, axis=1, keepdims=True))
    return ((s[0] / std) * (xf - mean + m[0])).astype(x.dtype)


if __name__ == "__main__":
    key = jax.random.PRNGKey(0)
    k1, k2 = jax.random.split(key)

    # Deterministic params matching nn.Parameter(torch.zeros(1) / torch.ones(1)).
    m = jnp.zeros((1,), dtype=jnp.float32)
    s = jnp.ones((1,), dtype=jnp.float32)

    # Case 1: L = 16*16 = 256 (lane-aligned).
    x1 = jax.random.normal(k1, (2, 4, 16, 16), dtype=jnp.float32)
    y1 = jax.block_until_ready(transposed_ln(x1, m, s))
    np.testing.assert_allclose(np.asarray(y1), np.asarray(_reference(x1, m, s)),
                               rtol=1e-4, atol=1e-5)

    # Case 2: L = 15*15 = 225 (ragged) -- exercises the masked boundary tile
    # path that replaced the host-side pad/slice.
    x2 = jax.random.normal(k2, (2, 4, 15, 15), dtype=jnp.float32)
    y2 = jax.block_until_ready(transposed_ln(x2, m, s))
    np.testing.assert_allclose(np.asarray(y2), np.asarray(_reference(x2, m, s)),
                               rtol=1e-4, atol=1e-5)

    print("KERNEL_OK")
</pallas_src>

<mosaic_0001>
module attributes {stable_mosaic.version = 11 : i64} {
  func.func @_transposed_ln_kernel(%arg0: i32, %arg1: i32, %arg2: memref<1xf32, #tpu.memory_space<smem>>, %arg3: memref<1xf32, #tpu.memory_space<smem>>, %arg4: memref<1x4x256xf32, #tpu.memory_space<vmem>>, %arg5: memref<1x4x256xf32, #tpu.memory_space<vmem>>) attributes {dimension_semantics = [#tpu.dimension_semantics<parallel>, #tpu.dimension_semantics<parallel>], iteration_bounds = array<i64: 2, 1>, scalar_prefetch = 0 : i64, scratch_operands = 0 : i64, tpu.core_type = #tpu.core_type<tc>, window_params = [{transform_indices = @transform_0, window_bounds = array<i64: 1>}, {transform_indices = @transform_1, window_bounds = array<i64: 1>}, {transform_indices = @transform_2, window_bounds = array<i64: 1, 4, 256>}, {transform_indices = @transform_3, window_bounds = array<i64: 1, 4, 256>}]} {
    %c0 = arith.constant 0 : index
    %c0_0 = arith.constant 0 : index
    %c0_1 = arith.constant 0 : index
    %0 = vector.load %arg4[%c0, %c0_0, %c0_1] : memref<1x4x256xf32, #tpu.memory_space<vmem>>, vector<1x4x256xf32>
    %cst = arith.constant dense<0.000000e+00> : vector<1x256xf32>
    %1 = vector.multi_reduction <add>, %0, %cst [1] : vector<1x4x256xf32> to vector<1x256xf32>
    %2 = vector.shape_cast %1 : vector<1x256xf32> to vector<1x1x256xf32>
    %cst_2 = arith.constant 2.500000e-01 : f32
    %3 = vector.broadcast %cst_2 : f32 to vector<1x1x256xf32>
    %4 = arith.mulf %2, %3 : vector<1x1x256xf32>
    %5 = vector.broadcast %4 : vector<1x1x256xf32> to vector<1x4x256xf32>
    %6 = arith.subf %0, %5 : vector<1x4x256xf32>
    %7 = arith.mulf %6, %6 : vector<1x4x256xf32>
    %cst_3 = arith.constant dense<0.000000e+00> : vector<1x256xf32>
    %8 = vector.multi_reduction <add>, %7, %cst_3 [1] : vector<1x4x256xf32> to vector<1x256xf32>
    %9 = vector.shape_cast %8 : vector<1x256xf32> to vector<1x1x256xf32>
    %cst_4 = arith.constant 2.500000e-01 : f32
    %10 = vector.broadcast %cst_4 : f32 to vector<1x1x256xf32>
    %11 = arith.mulf %9, %10 : vector<1x1x256xf32>
    %12 = math.rsqrt %11 : vector<1x1x256xf32>
    %c0_5 = arith.constant 0 : index
    %13 = memref.load %arg2[%c0_5] : memref<1xf32, #tpu.memory_space<smem>>
    %c0_6 = arith.constant 0 : index
    %14 = memref.load %arg3[%c0_6] : memref<1xf32, #tpu.memory_space<smem>>
    %15 = vector.broadcast %14 : f32 to vector<1x1x256xf32>
    %16 = arith.mulf %15, %12 : vector<1x1x256xf32>
    %17 = vector.broadcast %13 : f32 to vector<1x4x256xf32>
    %18 = arith.addf %6, %17 : vector<1x4x256xf32>
    %19 = vector.broadcast %16 : vector<1x1x256xf32> to vector<1x4x256xf32>
    %20 = arith.mulf %19, %18 : vector<1x4x256xf32>
    %c0_7 = arith.constant 0 : index
    %c0_8 = arith.constant 0 : index
    %c0_9 = arith.constant 0 : index
    %21 = vector.load %arg5[%c0_7, %c0_8, %c0_9] : memref<1x4x256xf32, #tpu.memory_space<vmem>>, vector<1x4x256xf32>
    tpu.vector_store %arg5[%c0_7, %c0_8, %c0_9], %20 {strides = array<i32>} : memref<1x4x256xf32, #tpu.memory_space<vmem>>, vector<1x4x256xf32>,
    return
  }
  func.func @transform_0(%arg0: i32, %arg1: i32) -> i32 {
    %c0_i32 = arith.constant 0 : i32
    %c0_i32_0 = arith.constant 0 : i32
    return %c0_i32 : i32
  }
  func.func @transform_1(%arg0: i32, %arg1: i32) -> i32 {
    %c0_i32 = arith.constant 0 : i32
    %c0_i32_0 = arith.constant 0 : i32
    return %c0_i32 : i32
  }
  func.func @transform_2(%arg0: i32, %arg1: i32) -> (i32, i32, i32) {
    %c0_i32 = arith.constant 0 : i32
    %c0_i32_0 = arith.constant 0 : i32
    return %arg0, %c0_i32, %arg1 : i32, i32, i32
  }
  func.func @transform_3(%arg0: i32, %arg1: i32) -> (i32, i32, i32) {
    %c0_i32 = arith.constant 0 : i32
    %c0_i32_0 = arith.constant 0 : i32
    return %arg0, %c0_i32, %arg1 : i32, i32, i32
  }
}

</mosaic_0001>

<bundles_post_ra>
// kernel: tpu_custom_call.1
= control target key start
LH: loop header
LB: loop body
LE: loop exit
PB: predicated region body
PF: predicated region fallthrough
CT: control target
= control target key end

     0   :  { %s739_s0 = inlined_call_operand.<no memory space> [shape: f32[1], index: 0, kind: input, shape index: {}]   ;;  %s740_s1 = inlined_call_operand.<no memory space> [shape: f32[1], index: 1, kind: input, shape index: {}]   ;;  %s741_s2 = inlined_call_operand.hbm [shape: f32[2,4,256], index: 2, kind: input, shape index: {}]   ;;  %s742_s3 = inlined_call_operand.hbm [shape: f32[2,4,256], index: 3, kind: output, shape index: {}]  }
   0x1   :  { %8 = sst [smem:[#allocation2]] %s739_s0 }
   0x2   :  { %9 = sst [smem:[#allocation3]] %s740_s1 }
   0x3   :  { %10 = vsyncpa [#allocation5], 0 }
   0x4   :  { %12 = vsyncpa [#allocation5 + $0x1], 0 }
   0x5   :  { %13 = vsyncpa [#allocation6], 0 }
   0x6   :  { %15 = vsyncpa [#allocation6 + $0x1], 0  ;;  %s597_s16 = smov 0   ;;  %s599_s17 = smov 0  }
   0x7   :  { %s601_s18 = smov 0   ;;  %s603_s19 = smov 0  }
   0x8   :  { %s605_s20 = smov 0   ;;  %s607_s21 = smov 0  }
   0x9 LB: > { %s375_s0 = sadd.s32 4294967295, %s567_s21   ;;  %s376_s1 = sadd.s32 4294967294, %s567_s21   ;;  %s567_s21 = sphi %s607_s21, %s21_s21   ;;  %s563_s20 = sphi %s605_s20, %s754_s20   ;;  %s559_s19 = sphi %s603_s19, %s753_s19   ;;  %s555_s18 = sphi %s601_s18, %s752_s18   ;;  %s551_s17 = sphi %s599_s17, %s751_s17   ;;  %s547_s16 = sphi %s597_s16, %s750_s16  }
   0xa   : > { %s33_s22 = sadd.s32 1, %s563_s20  ;;  %s84_s23 = sadd.s32 1, %s555_s18 }
   0xb   : > { %p35_p0 = scmp.ge.s32.totalorder %s33_s22, 2  ;;  %p91_p1 = scmp.ne.s32.totalorder %s555_s18, %s551_s17 }
   0xc   : > { %p92_p2 = scmp.eq.s32.totalorder %s567_s21, 0  ;;  %p97_p3 = scmp.ne.s32.totalorder %s551_s17, %s547_s16 }
   0xd   : > { %s756_s22 = smov (%p35_p0, %s33_s22), 0  ;;  %p98_p5 = scmp.eq.s32.totalorder %s375_s0, 0 }
   0xe   : > { %p638_p4 = por %p92_p2, %p91_p1  ;;  %s79_s25 = ssub.s32 %s563_s20, %s756_s22 }
   0xf   : > { %p123_p6 = scmp.eq.s32.totalorder %s375_s0, 1  ;;  %p82_p7 = scmp.eq.s32.totalorder %s79_s25, 0 }
  0x10   : > { %p644_p8 = por %p98_p5, %p97_p3  ;;  %p129_p10 = scmp.eq.s32.totalorder %s376_s1, 1 }
  0x11   : > { %p648_p9 = por %p123_p6, %p91_p1  ;;  %p404_p13 = scmp.lt.s32.totalorder %s567_s21, 2 }
  0x12   : > { %s653_s28 = scalar_select %p82_p7, %s555_s18, %s84_s23  }
  0x13   : > { %p655_p11 = por %p129_p10, %p97_p3  ;;  %s155_s30 = sand.u32 1, %s555_s18  }
  0x14   : > { %s379_s4 = sshll.u32 %s155_s30, 3  ;;  %s390_s5 = sshll.u32 %s563_s20, 7 }
  0x15   : > { %s746_s29 = scalar_select %p655_p11, 1, 0 }
  0x16   : > { %s167_s8 = scalar_lea.hbm %s741_s2, %s390_s5  ;;  %s159_s9 = scalar_lea.vmem [#allocation4], %s379_s4 }
  0x17   : > { %s169_s10 = sshll.u32 %s159_s9, 4  ;;  %p668_p0 = pnand %p404_p13, %p638_p4  ;;  %s170_s10 = int_to_ptr.vmem [resolvable:$true] %s169_s10 }
  0x18   : > { %p382_p1 = scmp.ge.s32.totalorder %s567_s21, 1  ;;  %p174_p2 = scmp.lt.s32.totalorder %s567_s21, 3 }
  0x19   : > { %s156_s12 = scalar_lea.sflag [#allocation5], %s155_s30  ;;  %p461_p3 = pneg %p668_p0 }
  0x1a   : > { %s472_s13 = scalar_lea.vmem %s170_s10, 128  ;;  %s569_s14 = smov [#allocation4]  }
  0x1b   : > { %p473_p5 = scmp.ne.s32.totalorder %s170_s10, %s472_s13  ;;  %s477_s15 = sshll.u32 %s569_s14, 4  ;;  %s478_s15 = int_to_ptr.vmem [resolvable:$false] %s477_s15 }
  0x1c   : > { %s479_s0 = scalar_lea.vmem %s478_s15, 256  ;;  %p480_p10 = scmp.lt.s32.totalorder %s170_s10, %s478_s15 }
  0x1d   : > { %p475_p6 = pnand %p473_p5, %p461_p3  ;;  %p481_p12 = scmp.lt.s32.totalorder %s479_s0, %s472_s13 }
  0x1f   : > { %p476_p7 = pneg %p475_p6  ;;  %p482_p4 = por %p481_p12, %p480_p10 }
  0x21   : > { %p483_p13 = pnand %p482_p4, %p476_p7 }
  0x23   : > { %486 = shalt.err (!%p483_p13)
}
  0x24   : > { %399 = dma.hbm_to_vmem [thread:$0]  (!%p668_p0), %s167_s8, 128, %s170_s10, %s156_s12  }
  0x25   : > { %p175_p11 = pnand %p382_p1, %p174_p2 }
  0x26   : > { %s683_s1 = sand.u32 (!%p175_p11), 1, %s551_s17  }
  0x27   : > { %178 = sbr.rel (%p175_p11) target bundleno = 119 (0x77), region = 32  ;;  %s383_s23 = sshll.u32 (!%p175_p11), %s683_s1, 3 }
  0x28   : > { %s181_s24 = scalar_lea.sflag (!%p175_p11), [#allocation5], %s683_s1  ;;  %s184_s25 = scalar_lea.vmem (!%p175_p11), [#allocation4], %s383_s23 }
  0x2c   : > { %538 = dma.done.wait (%p644_p8), %s181_s24, 128  }
  0x2d   : > { %540 = vsyncadd (%p644_p8), %s181_s24, 4294967168  ;;  %vm213_vm0 = vcmask 1043456   ;;  %v209_v0 = vld [vmem:[%s184_s25] sm:$0xff]  ;;  %s257_s26 = sld [smem:[#allocation2]]  ;;  %s206_s4 = scalar_lea.vmem [#allocation7], %s383_s23 }
  0x2e   : > { %v211_v1 = vcombine.high %v209_v0, %v209_v0  ;;  %v214_v2 = vsel %vm213_vm0, %v209_v0, 0.0  ;;  %s258_s30 = sld [smem:[#allocation3]]  ;;  %s291_s5 = sshll.u32 %s206_s4, 4  ;;  %s292_s5 = int_to_ptr.vmem [resolvable:$true] %s291_s5 }
  0x2f   : > { %v215_v3 = vrot.slane %v214_v2, 4  ;;  %s391_s6 = sshll.u32 %s559_s19, 7  ;;  %s275_s10 = scalar_lea.sflag [#allocation6], %s683_s1 }
  0x30   : > { %v221_v4 = vsel %vm213_vm0, %v211_v1, 0.0  ;;  %s289_s9 = scalar_lea.hbm %s742_s3, %s391_s6  ;;  %s487_s11 = scalar_lea.vmem %s292_s5, 128 }
  0x31   : > { %v216_v5 = vadd.f32 %v215_v3, %v214_v2  ;;  %v222_v6 = vrot.slane %v221_v4, 4  ;;  %p488_p8 = scmp.ne.s32.totalorder %s292_s5, %s487_s11  ;;  %s570_s12 = smov [#allocation7]  }
  0x32   : > { %s491_s13 = sshll.u32 %s570_s12, 4  ;;  %s492_s13 = int_to_ptr.vmem [resolvable:$false] %s491_s13 }
  0x33   : > { %v217_v7 = vrot.slane %v216_v5, 2  ;;  %v223_v8 = vadd.f32 %v222_v6, %v221_v4  ;;  %v262_v38 = vstv %s257_s26  ;;  %p489_p11 = pnand %p488_p8, %p648_p9  ;;  %s493_s14 = scalar_lea.vmem %s492_s13, 256 }
  0x34   : > { %v259_v40 = vstv %s258_s30  ;;  %p494_p0 = scmp.lt.s32.totalorder %s292_s5, %s492_s13  ;;  %p495_p1 = scmp.lt.s32.totalorder %s493_s14, %s487_s11 }
  0x35   : > { %v218_v9 = vadd.f32 %v217_v7, %v216_v5  ;;  %v224_v10 = vrot.slane %v223_v8, 2  ;;  %p490_p12 = pneg %p489_p11 }
  0x36   : > { %p496_p2 = por %p495_p1, %p494_p0 }
  0x37   : > { %v219_v11 = vrot.slane %v218_v9, 1  ;;  %v225_v12 = vadd.f32 %v224_v10, %v223_v8 }
  0x38   : > { %p497_p3 = pnand %p496_p2, %p490_p12 }
  0x39   : > { %v220_v13 = vadd.f32 %v219_v11, %v218_v9  ;;  %v226_v14 = vrot.slane %v225_v12, 1 }
  0x3b   : > { %v227_v15 = vadd.f32 %v226_v14, %v225_v12  ;;  %v228_v16 = vmul.f32 0.25, %v220_v13 }
  0x3d   : > { %v229_v17 = vmul.f32 0.25, %v227_v15 }
  0x3f   : > { %v232_v18 = vcombine.low %v228_v16, %v229_v17 }
  0x41   : > { %v234_v19 = vsub.f32 %v209_v0, %v232_v18 }
  0x43   : > { %v235_v20 = vmul.f32 %v234_v19, %v234_v19  ;;  %v263_v39 = vadd.f32 %v262_v38, %v234_v19 }
  0x45   : > { %v237_v21 = vcombine.high %v235_v20, %v235_v20  ;;  %v239_v22 = vsel %vm213_vm0, %v235_v20, 0.0  ;;  %v265_v43 = vcombine.high %v263_v39, %v263_v39 }
  0x46   : > { %v240_v23 = vrot.slane %v239_v22, 4 }
  0x47   : > { %v246_v24 = vsel %vm213_vm0, %v237_v21, 0.0 }
  0x48   : > { %v241_v25 = vadd.f32 %v240_v23, %v239_v22  ;;  %v247_v26 = vrot.slane %v246_v24, 4 }
  0x4a   : > { %v242_v27 = vrot.slane %v241_v25, 2  ;;  %v248_v28 = vadd.f32 %v247_v26, %v246_v24 }
  0x4c   : > { %v243_v29 = vadd.f32 %v242_v27, %v241_v25  ;;  %v249_v30 = vrot.slane %v248_v28, 2 }
  0x4e   : > { %v244_v31 = vrot.slane %v243_v29, 1  ;;  %v250_v32 = vadd.f32 %v249_v30, %v248_v28 }
  0x50   : > { %v245_v33 = vadd.f32 %v244_v31, %v243_v29  ;;  %v251_v34 = vrot.slane %v250_v32, 1 }
  0x52   : > { %v252_v35 = vadd.f32 %v251_v34, %v250_v32  ;;  %v253_v36 = vmul.f32 0.25, %v245_v33 }
  0x54   : > { %v254_v37 = vmul.f32 0.25, %v252_v35  ;;  %455 = vrsqrt.f32 %v253_v36 }
  0x56   : > { %457 = vrsqrt.f32 %v254_v37 }
  0x61   : > { %v456_v41 = vpop.eup %455 }
  0x62   : > { %v260_v42 = vmul.f32 %v456_v41, %v259_v40 }
  0x63   : > { %v458_v44 = vpop.eup %457 }
  0x64   : > { %v261_v45 = vmul.f32 %v458_v44, %v259_v40  ;;  %v267_v46 = vmul.f32 %v263_v39, %v260_v42 }
  0x66   : > { %v268_v47 = vmul.f32 %v265_v43, %v261_v45 }
  0x68   : > { %v271_v48 = vcombine.low %v267_v46, %v268_v47 }
  0x6a   : > { %273 = vst [vmem:[%s206_s4] sm:$0xff] %v271_v48 }
  0x6b   : > { %500 = shalt.err (!%p497_p3)
}
  0x6c   : > { %s501_s19 = scalar_lea.hbm %s289_s9, 128  ;;  %s505_s1 = scalar_lea.hbm %s742_s3, 256 }
  0x6d   : > { %p502_p5 = scmp.ne.s32.totalorder %s289_s9, %s501_s19  ;;  %p506_p10 = scmp.lt.s32.totalorder %s289_s9, %s742_s3 }
  0x6e   : > { %p507_p4 = scmp.lt.s32.totalorder %s505_s1, %s501_s19 }
  0x6f   : > { %p503_p6 = pnand %p502_p5, %p648_p9 }
  0x70   : > { %p508_p13 = por %p507_p4, %p506_p10 }
  0x71   : > { %p504_p7 = pneg %p503_p6 }
  0x73   : > { %p509_p8 = pnand %p508_p13, %p504_p7 }
  0x75   : > { %512 = shalt.err (!%p509_p8)
}
  0x76   : > { %394 = dma.vmem_to_hbm [thread:$0]  (%p648_p9), %s292_s5, 128, %s289_s9, %s275_s10  }
  0x77 PF: > { %s303_s25 = sand.u32 1, %s547_s16   ;;  %p748_p11 = scmp.ne.s32.totalorder %s746_s29, 0 }
  0x78   : > { %p749_p12 = scmp.ge.s32.totalorder %s567_s21, 2  ;;  %s304_s26 = scalar_lea.sflag [#allocation6], %s303_s25 }
  0x7a   : > { %p401_p0 = pnand %p749_p12, %p748_p11 }
  0x7c   : > { %p402_p1 = pneg %p401_p0 }
  0x7e   : > { %542 = dma.done.wait (%p402_p1), %s304_s26, 128  }
  0x7f   : > { %544 = vsyncadd (%p402_p1), %s304_s26, 4294967168  ;;  %s21_s21 = sadd.s32 1, %s567_s21   ;;  %s750_s16 = smov %s551_s17 }
  0x80   : > { %p18_p2 = scmp.ge.s32.totalorder %s21_s21, 4   ;;  %s751_s17 = smov %s555_s18 }
  0x81   : > { %s752_s18 = smov %s653_s28  ;;  %s753_s19 = smov %s563_s20 }
  0x82   : > { %s754_s20 = smov %s756_s22  ;;  %20 = sbr.rel (!%p18_p2) target bundleno = 9 (0x9), region = 77 }
  0x87   :  { %309 = vsyncpa [#allocation5], 1 }
  0x88   :  { %311 = vsyncpa [#allocation5 + $0x1], 1 }
  0x89   :  { %312 = vsyncpa [#allocation6], 1 }
  0x8a   :  { %314 = vsyncpa [#allocation6 + $0x1], 1 }

</bundles_post_ra>
